<compile_context>
chip_gen: v7x
topology: tpu7x:2x2x1
jax: 0.10.0
libtpu: 0.0.40
codegen_flags: <defaults>
</compile_context>

<pallas_src>
import jax
import jax.numpy as jnp
from jax.experimental import pallas as pl
from jax.experimental.pallas import tpu as pltpu


def _round_up(x, m):
    return (x + m - 1) // m * m


def _vmem_limit_bytes():
    """Explicit scoped-VMEM limit: half of physical VMEM, capped at 64 MiB.
    v7x: 64 MiB physical -> 32 MiB limit; v5e/v6e: 128 MiB -> 64 MiB limit."""
    cap = 64 * 1024 * 1024
    try:
        cap = int(getattr(pltpu.get_tpu_info(), "vmem_capacity_bytes", cap))
    except Exception:
        pass
    return int(min(cap // 2, 64 * 1024 * 1024))


def _choose_tile_v(T, K, v128, budget_bytes, max_tile=8192):
    """Largest multiple-of-128 voxel tile whose pipelined VMEM working set
    (double-buffered locations + output tiles, plus the f32 dist2/factors and bf16
    factors intermediates) fits in budget_bytes, then rebalanced so the padded V
    wastes at most one 128-lane chunk."""
    bytes_per_lane = 4 * (2 * 8 + 2 * T + 2 * K) + 2 * K
    tile = max(128, min((budget_bytes // bytes_per_lane) // 128 * 128, max_tile, v128))
    num_tiles = -(-v128 // tile)
    tile = _round_up(-(-v128 // num_tiles), 128)
    return int(tile)


def _htfa_block_kernel(p_ref, loc_ref, w_ref, out_ref):
    """One grid step = (block b, voxel tile v).

    p_ref:   (1, K, 8)       packed per-block params [cx, cy, cz, -exp(-log_width), 0...]
                             (resident across all V tiles of the block)
    loc_ref: (8, TILE_V)     voxel locations tile, rows [x, y, z, 0, 0, 0, 0, 0]
    w_ref:   (1, T, K)       per-time factor weights (resident across V tiles)
    out_ref: (1, T, TILE_V)  predicted voxel activations (mean of likelihood Normal)
    """
    p = p_ref[0]                                           # (K, 8)
    K = p.shape[0]
    TV = loc_ref.shape[1]

    # Squared distance ||loc_v - center_k||^2 in the cancellation-safe diff-square form.
    dist2 = jnp.zeros((K, TV), jnp.float32)
    for d in range(3):                                     # static unroll over x/y/z
        diff = loc_ref[d:d + 1, :] - p[:, d:d + 1]         # (1,TV) - (K,1) -> (K,TV)
        dist2 = dist2 + diff * diff

    neg_inv_width = p[:, 3:4]                              # (K, 1) = -exp(-log_width), precomputed
    factors = jnp.exp(dist2 * neg_inv_width)               # (K, TV): single EUP exp per element

    # predictions = weights @ factors on the MXU (bf16 operands, f32 accumulate)
    out_ref[0] = jnp.dot(w_ref[0].astype(jnp.bfloat16),
                         factors.astype(jnp.bfloat16),
                         preferred_element_type=jnp.float32)


def htfa_forward_kernel(locations_v3, centers_bk3, log_widths_bk, weights_btk):
    """TFAGenerativeLikelihood mean for all blocks: (B, T, V) = weights @ RBF(loc, centers)."""
    locations_v3 = locations_v3.astype(jnp.float32)
    centers_bk3 = centers_bk3.astype(jnp.float32)
    log_widths_bk = log_widths_bk.astype(jnp.float32)
    weights_btk = weights_btk.astype(jnp.float32)

    B, K, _ = centers_bk3.shape
    _, T, _ = weights_btk.shape
    V = locations_v3.shape[0]

    vmem_limit = _vmem_limit_bytes()
    tile_v = _choose_tile_v(T, K, _round_up(V, 128), budget_bytes=vmem_limit - 8 * 1024 * 1024)
    v_pad = _round_up(V, tile_v)
    num_v_tiles = v_pad // tile_v

    # Voxel locations, (8, V_pad): rows [x, y, z, 0...]; sublane-aligned, lane-padded with 0
    # (padded columns produce finite garbage that is sliced off below).
    loc_rows = jnp.zeros((8, v_pad), jnp.float32).at[:3, :V].set(locations_v3.T)

    # Packed per-block params: one lane-friendly DMA per block instead of several tiny ones.
    # exp(-log_width) hoisted here so the kernel's only transcendental is the factor exp.
    neg_inv_width = -jnp.exp(-log_widths_bk)                       # (B, K)
    params = jnp.zeros((B, K, 8), jnp.float32)
    params = params.at[..., :3].set(centers_bk3)
    params = params.at[..., 3].set(neg_inv_width)

    cost = pl.CostEstimate(
        flops=2 * B * T * K * v_pad + 9 * B * K * v_pad,
        transcendentals=B * K * v_pad,
        bytes_accessed=4 * (B * 8 * v_pad + B * K * 8 + B * T * K + B * T * v_pad),
    )

    out = pl.pallas_call(
        _htfa_block_kernel,
        out_shape=jax.ShapeDtypeStruct((B, T, v_pad), jnp.float32),
        grid_spec=pltpu.PrefetchScalarGridSpec(
            num_scalar_prefetch=0,
            grid=(B, num_v_tiles),                                  # V is the inner axis
            in_specs=[
                pl.BlockSpec((1, K, 8), lambda b, v: (b, 0, 0)),    # packed centers / widths
                pl.BlockSpec((8, tile_v), lambda b, v: (0, v)),     # voxel-location tile
                pl.BlockSpec((1, T, K), lambda b, v: (b, 0, 0)),    # per-time weights
            ],
            out_specs=pl.BlockSpec((1, T, tile_v), lambda b, v: (b, 0, v)),
        ),
        compiler_params=pltpu.CompilerParams(
            dimension_semantics=("parallel", "parallel"),           # both TCs on v7x
            vmem_limit_bytes=vmem_limit,
        ),
        cost_estimate=cost,
    )(params, loc_rows, weights_btk)

    return out[:, :, :V] if v_pad != V else out


# ---------------------------------------------------------------------------
# Plain-JAX glue: hierarchical prior (HTFAGenerativeHyperParams +
# HTFAGenerativeTemplatePrior + HTFAGenerativeSubjectPrior), sampled
# deterministically from the given key.
# ---------------------------------------------------------------------------
def htfa_model_forward(key, locations_v3, num_blocks, num_times, num_factors):
    K = num_factors
    B = num_blocks
    T = num_times[0]
    assert all(t == T for t in num_times), "demo stacks blocks; equal num_times assumed"

    # HTFAGenerativeHyperParams (volume=None path -> coefficient = 1.0)
    # TODO(synk): scipy ConvexHull volume path (volume is not None) is skipped;
    #             coefficient stays 1.0 as in the volume=None branch.
    brain_center = jnp.mean(locations_v3, axis=0)             # (3,)
    brain_center_std = jnp.std(locations_v3, axis=0)          # (3,)
    coefficient = 1.0
    tmpl_centers_mu = jnp.broadcast_to(brain_center, (K, 3))
    tmpl_centers_sigma = jnp.broadcast_to(brain_center_std / coefficient, (K, 3))
    tmpl_lw_mu = jnp.ones((K,)) * jnp.log(coefficient)
    tmpl_lw_sigma = jnp.ones((K,))                            # exp(0)
    weights_mu = jnp.zeros((K,))
    weights_sigma = jnp.ones((K,))                            # exp(0)

    keys = jax.random.split(key, 2 + 3 * B)

    # HTFAGenerativeTemplatePrior: template ~ Normal(mu, exp(log_sigma))
    template_centers = tmpl_centers_mu + tmpl_centers_sigma * jax.random.normal(keys[0], (K, 3))
    template_log_widths = tmpl_lw_mu + tmpl_lw_sigma * jax.random.normal(keys[1], (K,))

    # HTFAGenerativeSubjectPrior: per-block params ~ Normal(template, 1), weights ~ Normal(0, 1)
    centers, log_widths, weights = [], [], []
    for b in range(B):
        kc, kw_, kwt = keys[2 + 3 * b], keys[3 + 3 * b], keys[4 + 3 * b]
        centers.append(template_centers + jax.random.normal(kc, (K, 3)))
        log_widths.append(template_log_widths + jax.random.normal(kw_, (K,)))
        weights.append(weights_mu + weights_sigma * jax.random.normal(kwt, (T, K)))

    centers_bk3 = jnp.stack(centers).astype(jnp.float32)      # (B, K, 3)
    log_widths_bk = jnp.stack(log_widths).astype(jnp.float32)  # (B, K)
    weights_btk = jnp.stack(weights).astype(jnp.float32)      # (B, T, K)

    # TFAGenerativeLikelihood hot path (RBF factors + weights @ factors) in Pallas.
    # TODO(synk): the likelihood's trace.normal(Y_mean, voxel_noise) observation draw
    #             is a per-element Gaussian sample; we return the Normal mean.
    return htfa_forward_kernel(locations_v3, centers_bk3, log_widths_bk, weights_btk)


def _reference(locations_v3, centers, log_widths, weights):
    # pure-JAX reference for the kernel's math (full f32 precision)
    loc = locations_v3[None, None, :, :]            # (1,1,V,3)
    c = centers[:, :, None, :]                      # (B,K,1,3)
    dist2 = jnp.sum((loc - c) ** 2, axis=-1)        # (B,K,V)
    factors = jnp.exp(-dist2 / jnp.exp(log_widths)[..., None])
    return jnp.einsum("btk,bkv->btv", weights, factors,
                      precision=jax.lax.Precision.HIGHEST)


if __name__ == "__main__":
    V, K, B, T = 128, 8, 2, 8
    num_times = [T] * B

    key = jax.random.PRNGKey(0)
    k_loc, k_model = jax.random.split(key)
    locations = jax.random.uniform(k_loc, (V, 3), jnp.float32, minval=-50.0, maxval=50.0)

    out = htfa_model_forward(k_model, locations, B, num_times, K)
    out = jax.block_until_ready(out)
    assert out.shape == (B, T, V) and out.dtype == jnp.float32

    # sanity check against pure-JAX reference of the same sampled parameters
    # (tolerance loosened for the bf16 MXU operands of the final matmul)
    keys = jax.random.split(k_model, 2 + 3 * B)
    brain_center = jnp.mean(locations, axis=0)
    brain_center_std = jnp.std(locations, axis=0)
    tmpl_c = (jnp.broadcast_to(brain_center, (K, 3))
              + jnp.broadcast_to(brain_center_std, (K, 3)) * jax.random.normal(keys[0], (K, 3)))
    tmpl_lw = jax.random.normal(keys[1], (K,))
    cs, lws, ws = [], [], []
    for b in range(B):
        cs.append(tmpl_c + jax.random.normal(keys[2 + 3 * b], (K, 3)))
        lws.append(tmpl_lw + jax.random.normal(keys[3 + 3 * b], (K,)))
        ws.append(jax.random.normal(keys[4 + 3 * b], (T, K)))
    ref = _reference(locations, jnp.stack(cs), jnp.stack(lws), jnp.stack(ws))
    assert jnp.allclose(out, ref, atol=5e-2, rtol=5e-2), "kernel mismatch vs reference"

    print("KERNEL_OK")
</pallas_src>

<mosaic_0001>
module attributes {stable_mosaic.version = 11 : i64} {
  func.func @_htfa_block_kernel(%arg0: i32, %arg1: i32, %arg2: memref<1x8x8xf32, #tpu.memory_space<vmem>>, %arg3: memref<8x128xf32, #tpu.memory_space<vmem>>, %arg4: memref<1x8x8xf32, #tpu.memory_space<vmem>>, %arg5: memref<1x8x128xf32, #tpu.memory_space<vmem>>) attributes {dimension_semantics = [#tpu.dimension_semantics<parallel>, #tpu.dimension_semantics<parallel>], iteration_bounds = array<i64: 2, 1>, scalar_prefetch = 0 : i64, scratch_operands = 0 : i64, tpu.core_type = #tpu.core_type<tc>, window_params = [{transform_indices = @transform_0, window_bounds = array<i64: 1, 8, 8>}, {transform_indices = @transform_1, window_bounds = array<i64: 8, 128>}, {transform_indices = @transform_2, window_bounds = array<i64: 1, 8, 8>}, {transform_indices = @transform_3, window_bounds = array<i64: 1, 8, 128>}]} {
    %c0 = arith.constant 0 : index
    %c0_0 = arith.constant 0 : index
    %c0_1 = arith.constant 0 : index
    %0 = vector.load %arg2[%c0, %c0_0, %c0_1] : memref<1x8x8xf32, #tpu.memory_space<vmem>>, vector<1x8x8xf32>
    %1 = vector.shape_cast %0 : vector<1x8x8xf32> to vector<8x8xf32>
    %cst = arith.constant 0.000000e+00 : f32
    %2 = vector.broadcast %cst : f32 to vector<8x128xf32>
    %c0_2 = arith.constant 0 : index
    %c0_3 = arith.constant 0 : index
    %3 = vector.load %arg3[%c0_2, %c0_3] : memref<8x128xf32, #tpu.memory_space<vmem>>, vector<1x128xf32>
    %4 = vector.extract_strided_slice %1 {offsets = [0, 0], sizes = [8, 1], strides = [1, 1]} : vector<8x8xf32> to vector<8x1xf32>
    %5 = vector.broadcast %3 : vector<1x128xf32> to vector<8x128xf32>
    %6 = vector.broadcast %4 : vector<8x1xf32> to vector<8x128xf32>
    %7 = arith.subf %5, %6 : vector<8x128xf32>
    %8 = arith.mulf %7, %7 : vector<8x128xf32>
    %9 = arith.addf %2, %8 : vector<8x128xf32>
    %c1 = arith.constant 1 : index
    %c0_4 = arith.constant 0 : index
    %10 = vector.load %arg3[%c1, %c0_4] : memref<8x128xf32, #tpu.memory_space<vmem>>, vector<1x128xf32>
    %11 = vector.extract_strided_slice %1 {offsets = [0, 1], sizes = [8, 1], strides = [1, 1]} : vector<8x8xf32> to vector<8x1xf32>
    %12 = vector.broadcast %10 : vector<1x128xf32> to vector<8x128xf32>
    %13 = vector.broadcast %11 : vector<8x1xf32> to vector<8x128xf32>
    %14 = arith.subf %12, %13 : vector<8x128xf32>
    %15 = arith.mulf %14, %14 : vector<8x128xf32>
    %16 = arith.addf %9, %15 : vector<8x128xf32>
    %c2 = arith.constant 2 : index
    %c0_5 = arith.constant 0 : index
    %17 = vector.load %arg3[%c2, %c0_5] : memref<8x128xf32, #tpu.memory_space<vmem>>, vector<1x128xf32>
    %18 = vector.extract_strided_slice %1 {offsets = [0, 2], sizes = [8, 1], strides = [1, 1]} : vector<8x8xf32> to vector<8x1xf32>
    %19 = vector.broadcast %17 : vector<1x128xf32> to vector<8x128xf32>
    %20 = vector.broadcast %18 : vector<8x1xf32> to vector<8x128xf32>
    %21 = arith.subf %19, %20 : vector<8x128xf32>
    %22 = arith.mulf %21, %21 : vector<8x128xf32>
    %23 = arith.addf %16, %22 : vector<8x128xf32>
    %24 = vector.extract_strided_slice %1 {offsets = [0, 3], sizes = [8, 1], strides = [1, 1]} : vector<8x8xf32> to vector<8x1xf32>
    %25 = vector.broadcast %24 : vector<8x1xf32> to vector<8x128xf32>
    %26 = arith.mulf %23, %25 : vector<8x128xf32>
    %27 = math.exp %26 : vector<8x128xf32>
    %c0_6 = arith.constant 0 : index
    %c0_7 = arith.constant 0 : index
    %c0_8 = arith.constant 0 : index
    %28 = vector.load %arg4[%c0_6, %c0_7, %c0_8] : memref<1x8x8xf32, #tpu.memory_space<vmem>>, vector<1x8x8xf32>
    %29 = vector.shape_cast %28 : vector<1x8x8xf32> to vector<8x8xf32>
    %30 = arith.truncf %29 : vector<8x8xf32> to vector<8x8xbf16>
    %31 = arith.truncf %27 : vector<8x128xf32> to vector<8x128xbf16>
    %cst_9 = arith.constant dense<0.000000e+00> : vector<8x128xf32>
    %32 = tpu.matmul %30, %31, %cst_9 {dimension_numbers = #tpu.dot_dimension_numbers<[1], [0], [0], [1], [0, 0, 1, 1], [], []>} : vector<8x8xbf16>, vector<8x128xbf16>, vector<8x128xf32> -> vector<8x128xf32>
    %c0_10 = arith.constant 0 : index
    %c0_11 = arith.constant 0 : index
    %c0_12 = arith.constant 0 : index
    %33 = vector.load %arg5[%c0_10, %c0_11, %c0_12] : memref<1x8x128xf32, #tpu.memory_space<vmem>>, vector<1x8x128xf32>
    %34 = vector.shape_cast %33 : vector<1x8x128xf32> to vector<8x128xf32>
    %35 = vector.shape_cast %32 : vector<8x128xf32> to vector<1x8x128xf32>
    tpu.vector_store %arg5[%c0_10, %c0_11, %c0_12], %35 {strides = array<i32>} : memref<1x8x128xf32, #tpu.memory_space<vmem>>, vector<1x8x128xf32>,
    return
  }
  func.func @transform_0(%arg0: i32, %arg1: i32) -> (i32, i32, i32) {
    %c0_i32 = arith.constant 0 : i32
    %c0_i32_0 = arith.constant 0 : i32
    %c0_i32_1 = arith.constant 0 : i32
    return %arg0, %c0_i32, %c0_i32_0 : i32, i32, i32
  }
  func.func @transform_1(%arg0: i32, %arg1: i32) -> (i32, i32) {
    %c0_i32 = arith.constant 0 : i32
    %c0_i32_0 = arith.constant 0 : i32
    return %c0_i32, %arg1 : i32, i32
  }
  func.func @transform_2(%arg0: i32, %arg1: i32) -> (i32, i32, i32) {
    %c0_i32 = arith.constant 0 : i32
    %c0_i32_0 = arith.constant 0 : i32
    %c0_i32_1 = arith.constant 0 : i32
    return %arg0, %c0_i32, %c0_i32_0 : i32, i32, i32
  }
  func.func @transform_3(%arg0: i32, %arg1: i32) -> (i32, i32, i32) {
    %c0_i32 = arith.constant 0 : i32
    %c0_i32_0 = arith.constant 0 : i32
    return %arg0, %c0_i32, %arg1 : i32, i32, i32
  }
}

</mosaic_0001>

<bundles_post_ra>
// kernel: tpu_custom_call.1
= control target key start
LH: loop header
LB: loop body
LE: loop exit
PB: predicated region body
PF: predicated region fallthrough
CT: control target
= control target key end

     0   :  { %8 = vsyncpa [#allocation3], 0  ;;  %s1071_s0 = inlined_call_operand.hbm [shape: f32[2,8,8], index: 0, kind: input, shape index: {}]   ;;  %s1072_s1 = inlined_call_operand.hbm [shape: f32[8,128], index: 1, kind: input, shape index: {}]   ;;  %s1073_s2 = inlined_call_operand.hbm [shape: f32[2,8,8], index: 2, kind: input, shape index: {}]   ;;  %s1074_s3 = inlined_call_operand.hbm [shape: f32[2,8,128], index: 3, kind: output, shape index: {}]  }
   0x1   :  { %10 = vsyncpa [#allocation3 + $0x1], 0 }
   0x2   :  { %11 = vsyncpa [#allocation6], 0 }
   0x3   :  { %12 = vsyncpa [#allocation4], 0 }
   0x4   :  { %14 = vsyncpa [#allocation4 + $0x1], 0  ;;  %s809_s12 = smov 0   ;;  %s811_s13 = smov 0  }
   0x5   :  { %s813_s14 = smov 0   ;;  %s815_s15 = smov 0  }
   0x6   :  { %s817_s16 = smov 0   ;;  %s819_s17 = smov 0  }
   0x7 LB: > { %s32_s18 = sadd.s32 1, %s773_s16  ;;  %s39_s19 = sadd.s32 1, %s765_s14  ;;  %s777_s17 = sphi %s819_s17, %s20_s17   ;;  %s773_s16 = sphi %s817_s16, %s1100_s16   ;;  %s769_s15 = sphi %s815_s15, %s1099_s15   ;;  %s765_s14 = sphi %s813_s14, %s1098_s14   ;;  %s761_s13 = sphi %s811_s13, %s1097_s13   ;;  %s757_s12 = sphi %s809_s12, %s1096_s12  }
   0x8   : > { %p34_p0 = scmp.ge.s32.totalorder %s32_s18, 2  ;;  %p46_p1 = scmp.ne.s32.totalorder %s765_s14, %s761_s13 }
   0x9   : > { %p47_p2 = scmp.eq.s32.totalorder %s777_s17, 0  ;;  %p534_p5 = scmp.lt.s32.totalorder %s777_s17, 2 }
   0xa   : > { %s1102_s18 = smov (%p34_p0, %s32_s18), 0  ;;  %s169_s21 = sand.u32 1, %s777_s17  }
   0xb   : > { %p48_p4 = por %p47_p2, %p46_p1  ;;  %s36_s20 = ssub.s32 %s773_s16, %s1102_s18 }
   0xc   : > { %p37_p6 = scmp.eq.s32.totalorder %s36_s20, 0  ;;  %s171_s22 = sand.u32 1, %s765_s14  }
   0xd   : > { %s484_s23 = sshll.u32 %s773_s16, 7  ;;  %s859_s25 = sshll.u32 %s171_s22, 3 }
   0xe   : > { %s857_s24 = scalar_select %p37_p6, %s765_s14, %s39_s19  }
   0xf   : > { %s866_s28 = scalar_lea.hbm %s1071_s0, %s484_s23  ;;  %p868_p7 = pnand %p534_p5, %p48_p4 }
  0x10   : > { %s173_s30 = scalar_lea.vmem [#allocation2], %s859_s25  ;;  %s875_s5 = scalar_lea.sflag [#allocation3], %s169_s21 }
  0x11   : > { %s180_s4 = sshll.u32 %s173_s30, 4  ;;  %s599_s6 = scalar_lea.hbm %s866_s28, 128  ;;  %s873_s4 = int_to_ptr.vmem [resolvable:$true] %s180_s4 }
  0x12   : > { %p600_p8 = scmp.ne.s32.totalorder %s866_s28, %s599_s6  ;;  %p601_p9 = pneg %p868_p7 }
  0x13   : > { %s604_s9 = scalar_lea.hbm %s1071_s0, 256  ;;  %p605_p12 = scmp.lt.u32.totalorder %s866_s28, %s1071_s0 }
  0x14   : > { %p602_p10 = pnand %p601_p9, %p600_p8  ;;  %p606_p13 = scmp.lt.u32.totalorder %s604_s9, %s599_s6 }
  0x15   : > { %p608_p2 = scmp.lt.u32.totalorder %s599_s6, %s866_s28 }
  0x16   : > { %p603_p11 = pneg %p602_p10  ;;  %p607_p0 = por %p606_p13, %p605_p12 }
  0x18   : > { %p609_p4 = por %p608_p2, %p607_p0 }
  0x1a   : > { %p610_p5 = pnand %p609_p4, %p603_p11 }
  0x1c   : > { %613 = shalt.err (!%p610_p5)
}
  0x1d   : > { %s614_s19 = scalar_lea.vmem %s873_s4, 128  ;;  %s779_s20 = smov [#allocation2]  }
  0x1e   : > { %p615_p6 = scmp.ne.s32.totalorder %s873_s4, %s614_s19  ;;  %s619_s21 = sshll.u32 %s779_s20, 4  ;;  %s620_s21 = int_to_ptr.vmem [resolvable:$false] %s619_s21 }
  0x1f   : > { %s621_s22 = scalar_lea.vmem %s620_s21, 256  ;;  %p622_p3 = scmp.lt.s32.totalorder %s873_s4, %s620_s21 }
  0x20   : > { %p617_p8 = pnand %p615_p6, %p601_p9  ;;  %p623_p12 = scmp.lt.s32.totalorder %s621_s22, %s614_s19 }
  0x22   : > { %p618_p10 = pneg %p617_p8  ;;  %p624_p13 = por %p623_p12, %p622_p3 }
  0x24   : > { %p625_p0 = pnand %p624_p13, %p618_p10 }
  0x26   : > { %628 = shalt.err (!%p625_p0)
}
  0x27   : > { %525 = dma.hbm_to_vmem [thread:$0]  (!%p868_p7), %s866_s28, 128, %s873_s4, %s875_s5  }
  0x28   : > { %s904_s26 = sadd.s32 4294967295, %s777_s17   ;;  %s479_s27 = sadd.s32 4294967294, %s777_s17  }
  0x29   : > { %p52_p3 = scmp.ne.s32.totalorder %s761_s13, %s757_s12  ;;  %p1075_p11 = scmp.eq.s32.totalorder %s904_s26, 0 }
  0x2a   : > { %p130_p2 = scmp.eq.s32.totalorder %s904_s26, 1  ;;  %p136_p4 = scmp.eq.s32.totalorder %s479_s27, 1 }
  0x2b   : > { %p480_p5 = scmp.ge.s32.totalorder %s777_s17, 1  ;;  %p914_p6 = por %p1075_p11, %p52_p3 }
  0x2c   : > { %p921_p8 = por %p130_p2, %p46_p1  ;;  %p925_p10 = por %p136_p4, %p52_p3 }
  0x2d   : > { %s1081_s30 = scalar_select %p914_p6, 1, 0 }
  0x2e   : > { %s1082_s28 = scalar_select %p921_p8, 1, 0 }
  0x2f   : > { %s1083_s4 = scalar_select %p925_p10, 1, 0 }
  0x30   : > { %p143_p12 = scmp.lt.s32.totalorder %s777_s17, 3  ;;  %s935_s8 = scalar_lea.hbm %s1073_s2, %s484_s23 }
  0x31   : > { %s780_s10 = smov [#allocation5]   ;;  %s191_s19 = scalar_lea.vmem [#allocation7], %s859_s25 }
  0x32   : > { %p937_p13 = pnand %p480_p5, %p143_p12  ;;  %s941_s11 = sshll.u32 %s780_s10, 4  ;;  %s159_s11 = int_to_ptr.vmem [resolvable:$true] %s941_s11 }
  0x33   : > { %s198_s20 = sshll.u32 %s191_s19, 4  ;;  %s629_s21 = scalar_lea.hbm %s935_s8, 128  ;;  %s199_s20 = int_to_ptr.vmem [resolvable:$true] %s198_s20 }
  0x34   : > { %s1084_s9 = scalar_select %p937_p13, 1, 0 }
  0x35   : > { %p630_p0 = scmp.ne.s32.totalorder %s935_s8, %s629_s21  ;;  %s634_s27 = scalar_lea.hbm %s1073_s2, 256 }
  0x36   : > { %p635_p4 = scmp.lt.u32.totalorder %s935_s8, %s1073_s2  ;;  %p636_p5 = scmp.lt.u32.totalorder %s634_s27, %s629_s21 }
  0x37   : > { %p632_p3 = pnand %p630_p0, %p601_p9  ;;  %p638_p11 = scmp.lt.u32.totalorder %s629_s21, %s935_s8 }
  0x38   : > { %p637_p12 = por %p636_p5, %p635_p4 }
  0x39   : > { %p633_p2 = pneg %p632_p3 }
  0x3a   : > { %p639_p10 = por %p638_p11, %p637_p12 }
  0x3c   : > { %p640_p1 = pnand %p639_p10, %p633_p2 }
  0x3e   : > { %643 = shalt.err (!%p640_p1)
}
  0x3f   : > { %s644_s25 = scalar_lea.vmem %s199_s20, 128  ;;  %s781_s10 = smov [#allocation7]  }
  0x40   : > { %p645_p8 = scmp.ne.s32.totalorder %s199_s20, %s644_s25  ;;  %s649_s19 = sshll.u32 %s781_s10, 4  ;;  %s650_s19 = int_to_ptr.vmem [resolvable:$false] %s649_s19 }
  0x41   : > { %s651_s23 = scalar_lea.vmem %s650_s19, 256  ;;  %p652_p6 = scmp.lt.s32.totalorder %s199_s20, %s650_s19 }
  0x42   : > { %p647_p0 = pnand %p645_p8, %p601_p9  ;;  %p653_p13 = scmp.lt.s32.totalorder %s651_s23, %s644_s25 }
  0x44   : > { %p648_p3 = pneg %p647_p0  ;;  %p654_p4 = por %p653_p13, %p652_p6 }
  0x46   : > { %p655_p5 = pnand %p654_p4, %p648_p3 }
  0x48   : > { %658 = shalt.err (!%p655_p5)
}
  0x49   : > { %528 = dma.hbm_to_vmem [thread:$0]  (!%p868_p7), %s935_s8, 128, %s199_s20, %s875_s5  }
  0x4a   : > { %p1085_p9 = scmp.eq.s32.totalorder %s904_s26, 0  ;;  %p1086_p11 = scmp.ne.s32.totalorder %s1084_s9, 0 }
  0x4b   : > { %s659_s6 = scalar_lea.hbm %s1072_s1, 128 }
  0x4c   : > { %p1087_p8 = pneg %p1086_p11  ;;  %p660_p6 = scmp.ne.s32.totalorder %s1072_s1, %s659_s6 }
  0x4d   : > { %p666_p2 = scmp.lt.u32.totalorder %s659_s6, %s1072_s1 }
  0x4e   : > { %p972_p10 = pnand %p1087_p8, %p1085_p9 }
  0x50   : > { %p661_p13 = pneg %p972_p10 }
  0x52   : > { %p662_p7 = pnand %p661_p13, %p660_p6 }
  0x54   : > { %p663_p1 = pneg %p662_p7 }
  0x56   : > { %p668_p12 = pnand %p666_p2, %p663_p1 }
  0x58   : > { %671 = shalt.err (!%p668_p12)
}
  0x59   : > { %s672_s20 = scalar_lea.vmem %s159_s11, 128  ;;  %p680_p5 = scmp.lt.s32.totalorder %s159_s11, %s159_s11 }
  0x5a   : > { %p673_p0 = scmp.ne.s32.totalorder %s159_s11, %s672_s20  ;;  %p681_p9 = scmp.lt.s32.totalorder %s672_s20, %s672_s20 }
  0x5c   : > { %p675_p3 = pnand %p673_p0, %p661_p13  ;;  %p682_p8 = por %p681_p9, %p680_p5 }
  0x5e   : > { %p676_p4 = pneg %p675_p3 }
  0x60   : > { %p683_p11 = pnand %p682_p8, %p676_p4 }
  0x62   : > { %686 = shalt.err (!%p683_p11)
}
  0x63   : > { %521 = dma.hbm_to_vmem [thread:$0]  (!%p972_p10), %s1072_s1, 128, %s159_s11, [#allocation6]  }
  0x64   : > { %p1089_p6 = scmp.ne.s32.totalorder %s1084_s9, 0 }
  0x65   : > { %s209_s19 = sand.u32 (!%p1089_p6), 1, %s904_s26   ;;  %s211_s23 = sand.u32 (!%p1089_p6), 1, %s761_s13  }
  0x66   : > { %207 = sbr.rel (%p1089_p6) target bundleno = 507 (0x1fb), region = 32  ;;  %s998_s22 = sshll.u32 (!%p1089_p6), %s211_s23, 3 }
  0x67   : > { %s210_s27 = scalar_lea.sflag (!%p1089_p6), [#allocation3], %s209_s19  ;;  %s213_s6 = scalar_lea.vmem (!%p1089_p6), [#allocation2], %s998_s22 }
  0x68   : > { %p1090_p11 = scmp.ne.s32.totalorder (!%p1089_p6), %s1081_s30, 0 }
  0x6d   : > { %740 = dma.done.wait (%p1090_p11), %s210_s27, 128  }
  0x6e   : > { %742 = vsyncadd (%p1090_p11), %s210_s27, 4294967168  ;;  %p1091_p10 = scmp.eq.s32.totalorder %s904_s26, 0 }
  0x70   : > { %744 = dma.done.wait (%p1091_p10), [#allocation6], 128   ;;  %p1092_p13 = pmov %p1091_p10 }
  0x71   : > { %s226_s9 = scalar_lea.vmem [#allocation7], %s998_s22 }
  0x72   : > { %746 = vsyncadd (%p1092_p13), [#allocation6], 4294967168 }
  0x73   : > { %748 = dma.done.wait (%p1090_p11), %s210_s27, 128  }
  0x74   : > { %750 = vsyncadd (%p1090_p11), %s210_s27, 4294967168  ;;  %v782_v0 = vmov 0   ;;  %v783_v1 = vmov 2   ;;  %v255_v2 = vld [vmem:[%s213_s6] sm:$0xff]  ;;  %v784_v3 = vmov 1   ;;  %v785_v4 = vmov 3  }
  0x75   : > { %592 = vset.pattern.permute.xlu0 %v782_v0  ;;  %594 = vset.pattern.permute.xlu1 %v783_v1  ;;  %v786_v5 = vmov 0.0   ;;  %vm787_vm0 = vmmov 0   ;;  %v492_v7 = vld [vmem:[#allocation5] ss:$0 sm:$0xff]  ;;  %v494_v8 = vld [vmem:[#allocation5 + $0x2] ss:$0 sm:$0xff] }
  0x76   : > { %263 = vperm.xlu0 %592, %v255_v2   ;;  %287 = vperm.xlu1 %594, %v255_v2   ;;  %v493_v10 = vld [vmem:[#allocation5 + $0x1] ss:$0 sm:$0xff]  ;;  %vm307_vm1 = vcmask 1043456   ;;  %v300_v24 = vld [vmem:[%s226_s9] sm:$0xff]  ;;  %vm303_vm2 = vcmask 64512   ;;  %s253_s26 = scalar_lea.vmem [#allocation8], %s998_s22 }
  0x77   : > { %502 = vmatprep.subr.bf16.mxu0 %v786_v5  ;;  %504 = vmatprep.mubr.msk.bf16.mxu0 %vm787_vm0, %v786_v5  ;;  %v301_v27 = vpack.c.bf16 %v300_v24, %v300_v24  ;;  %s367_s30 = sshll.u32 %s253_s26, 4  ;;  %s497_s11 = sshll.u32 %s769_s15, 7  ;;  %s1018_s30 = int_to_ptr.vmem [resolvable:$true] %s367_s30 }
  0x78   : > { %s1023_s7 = scalar_lea.hbm %s1074_s3, %s497_s11  ;;  %s353_s5 = scalar_lea.sflag [#allocation4], %s211_s23 }
  0x79   : > { %s687_s8 = scalar_lea.vmem %s1018_s30, 128  ;;  %p1093_p1 = scmp.ne.s32.totalorder %s1082_s28, 0 }
  0x7a   : > { %593 = vset.pattern.permute.xlu0 %v784_v3  ;;  %595 = vset.pattern.permute.xlu1 %v785_v4  ;;  %p688_p7 = scmp.ne.s32.totalorder %s1018_s30, %s687_s8  ;;  %s788_s15 = smov [#allocation8]  }
  0x7b   : > { %275 = vperm.xlu0 %593, %v255_v2   ;;  %294 = vperm.xlu1 %595, %v255_v2   ;;  %s691_s20 = sshll.u32 %s788_s15, 4  ;;  %s692_s20 = int_to_ptr.vmem [resolvable:$false] %s691_s20 }
  0x7c   : > { %p689_p2 = pnand %p688_p7, %p1093_p1  ;;  %s693_s25 = scalar_lea.vmem %s692_s20, 256 }
  0x7d   : > { %p694_p0 = scmp.lt.s32.totalorder %s1018_s30, %s692_s20  ;;  %p695_p3 = scmp.lt.s32.totalorder %s693_s25, %s687_s8 }
  0x7e   : > { %p690_p12 = pneg %p689_p2 }
  0x7f   : > { %596 = vset.pattern.permute.xlu0 %v785_v4  ;;  %p696_p4 = por %p695_p3, %p694_p0 }
  0x81   : > { %p697_p5 = pnand %p696_p4, %p690_p12 }
  0xf5   : > { %v264_v6 = vpop.permute.xlu0 %263  ;;  %v288_v9 = vpop.permute.xlu1 %287 }
  0xf6   : > { %v266_v11 = vsub.f32 %v492_v7, %v264_v6  ;;  %v290_v12 = vsub.f32 %v494_v8, %v288_v9 }
  0xf8   : > { %v267_v15 = vmul.f32 %v266_v11, %v266_v11  ;;  %v291_v17 = vmul.f32 %v290_v12, %v290_v12 }
  0xfa   : > { %v276_v13 = vpop.permute.xlu0 %275  ;;  %v295_v19 = vpop.permute.xlu1 %294 }
  0xfb   : > { %v278_v14 = vsub.f32 %v493_v10, %v276_v13 }
  0xfd   : > { %v279_v16 = vmul.f32 %v278_v14, %v278_v14 }
  0xff   : > { %v280_v18 = vadd.f32 %v279_v16, %v267_v15 }
 0x101   : > { %v292_v20 = vadd.f32 %v291_v17, %v280_v18 }
 0x103   : > { %v297_v21 = vmul.f32 %v295_v19, %v292_v20 }
 0x105   : > { %v298_v22 = vmul.f32 1.442695, %v297_v21 }
 0x107   : > { %597 = vpow2.f32 %v298_v22 }
 0x111   : > { %v598_v23 = vpop.eup %597 }
 0x112   : > { %v302_v25 = vpack.c.bf16 %v598_v23, %v598_v23 }
 0x114   : > { %v309_v26 = vsel %vm307_vm1, %v302_v25, 0 }
 0x115   : > { %503 = vmatpush3.bf16.msra.mxu0 %v309_v26 }
 0x118   : > { %505 = vmatmul.mubr.msk.bf16.vlgmr.msra.gmra.mrb[0].mxu0 %vm303_vm2, %v301_v27 }
 0x1eb   : > { %v345_v28 = vpop.f32.mrb[0].mxu0 }
 0x1ec   : > { %351 = vst [vmem:[%s253_s26] sm:$0xff] %v345_v28  ;;  %v506_v29 = vpop.f32.mrb[1].mxu0 }
 0x1ed   : > { %v348_v30 = vpop.f32.mrb[2].mxu0 }
 0x1ee   : > { %700 = shalt.err (!%p697_p5)
}
 0x1ef   : > { %s701_s10 = scalar_lea.hbm %s1023_s7, 128  ;;  %s705_s22 = scalar_lea.hbm %s1074_s3, 256 }
 0x1f0   : > { %p702_p9 = scmp.ne.s32.totalorder %s1023_s7, %s701_s10  ;;  %p706_p11 = scmp.lt.u32.totalorder %s1023_s7, %s1074_s3 }
 0x1f1   : > { %p707_p10 = scmp.lt.u32.totalorder %s705_s22, %s701_s10  ;;  %p709_p7 = scmp.lt.u32.totalorder %s701_s10, %s1023_s7 }
 0x1f2   : > { %p703_p8 = pnand %p702_p9, %p1093_p1 }
 0x1f3   : > { %p708_p13 = por %p707_p10, %p706_p11 }
 0x1f4   : > { %p704_p6 = pneg %p703_p8 }
 0x1f5   : > { %p710_p2 = por %p709_p7, %p708_p13 }
 0x1f7   : > { %p711_p12 = pnand %p710_p2, %p704_p6 }
 0x1f9   : > { %714 = shalt.err (!%p711_p12)
}
 0x1fa   : > { %516 = dma.vmem_to_hbm [thread:$0]  (%p1093_p1), %s1018_s30, 128, %s1023_s7, %s353_s5   ;;  %v507_v31 = vpop.f32.mrb[3].mxu0 }
 0x1fb PF: > { %s379_s9 = sand.u32 1, %s757_s12   ;;  %p1094_p0 = scmp.ne.s32.totalorder %s1083_s4, 0 }
 0x1fc   : > { %p1095_p3 = scmp.ge.s32.totalorder %s777_s17, 2  ;;  %s380_s26 = scalar_lea.sflag [#allocation4], %s379_s9 }
 0x1fe   : > { %p530_p4 = pnand %p1095_p3, %p1094_p0 }
 0x200   : > { %752 = dma.done.wait (!%p530_p4), %s380_s26, 128  }
 0x201   : > { %754 = vsyncadd (!%p530_p4), %s380_s26, 4294967168  ;;  %s20_s17 = sadd.s32 1, %s777_s17   ;;  %s1096_s12 = smov %s761_s13 }
 0x202   : > { %p17_p5 = scmp.ge.s32.totalorder %s20_s17, 4   ;;  %s1097_s13 = smov %s765_s14 }
 0x203   : > { %s1098_s14 = smov %s857_s24  ;;  %s1099_s15 = smov %s773_s16 }
 0x204   : > { %s1100_s16 = smov %s1102_s18  ;;  %19 = sbr.rel (!%p17_p5) target bundleno = 7 (0x7), region = 93 }
 0x20b   :  { %385 = vsyncpa [#allocation3], 1 }
 0x20c   :  { %387 = vsyncpa [#allocation3 + $0x1], 1 }
 0x20d   :  { %388 = vsyncpa [#allocation6], 1 }
 0x20e   :  { %389 = vsyncpa [#allocation4], 1 }
 0x20f   :  { %391 = vsyncpa [#allocation4 + $0x1], 1 }

</bundles_post_ra>
